<compile_context>
chip_gen: v5e
topology: v5e:2x2
jax: 0.10.0
libtpu: 0.0.40
codegen_flags: <defaults>
</compile_context>

<pallas_src>
import jax
import jax.numpy as jnp
from jax.experimental import pallas as pl
from jax.experimental.pallas import tpu as pltpu


def _round_up(x, m):
    return ((x + m - 1) // m) * m


def dqn_kernel(x_ref,
               w1_ref, b1_ref,
               w2_ref, b2_ref,
               w3_ref, b3_ref,
               w4_ref, b4_ref,
               o_ref):
    cd = w1_ref.dtype  # MXU operand dtype (bf16 by default, f32 optional)
    # hidden layer 1: (bm, obs) @ (obs, H) -> f32 accumulator
    h = jnp.dot(x_ref[...], w1_ref[...], preferred_element_type=jnp.float32)
    h = jnp.maximum(h + b1_ref[...], 0.0)          # bias + ReLU in f32 (VPU)
    # hidden layer 2
    h = jnp.dot(h.astype(cd), w2_ref[...], preferred_element_type=jnp.float32)
    h = jnp.maximum(h + b2_ref[...], 0.0)
    # hidden layer 3
    h = jnp.dot(h.astype(cd), w3_ref[...], preferred_element_type=jnp.float32)
    h = jnp.maximum(h + b3_ref[...], 0.0)
    # output layer (no activation)
    out = jnp.dot(h.astype(cd), w4_ref[...], preferred_element_type=jnp.float32)
    o_ref[...] = (out + b4_ref[...]).astype(o_ref.dtype)


def dqn_forward(x, params, *, block_batch=None, compute_dtype=jnp.bfloat16):
    """Fused DQN MLP forward pass.

    x:      (B, observation_dim) float32
    params: list of (W, b) with W (in, out) float32, b (1, out) float32
    Returns (B, action_dim) float32.
    """
    (w1, b1), (w2, b2), (w3, b3), (w4, b4) = params
    B, obs_dim = x.shape
    action_dim = w4.shape[1]

    # 16-row granularity is valid for both f32 (8-sublane) and bf16 (16) tiles.
    mult = 16
    if block_batch is None:
        if B <= 2 * mult:
            bm = _round_up(B, mult)
        else:
            # Cap the tile (pipelining) and keep >= 2 grid steps so v7x can
            # shard the parallel batch axis across its two TensorCores.
            bm = min(512, _round_up(pl.cdiv(B, 2), mult))
    else:
        bm = _round_up(block_batch, mult)

    Bp = _round_up(B, bm)
    grid = Bp // bm

    # Cast MXU operands (x, W) to the compute dtype; biases stay f32 and are
    # added to the f32 accumulator output.
    xc = x.astype(compute_dtype)
    if Bp != B:
        xc = jnp.pad(xc, ((0, Bp - B), (0, 0)))   # zero rows, sliced off below
    wc = [w.astype(compute_dtype) for (w, _) in params]
    bc = [b.astype(jnp.float32) for (_, b) in params]

    def full(arr):
        # Whole-array block, same block every grid step -> weights/biases stay
        # resident in VMEM for the entire grid.
        return pl.BlockSpec(arr.shape, lambda i: (0,) * arr.ndim)

    in_specs = [pl.BlockSpec((bm, obs_dim), lambda i: (i, 0))]
    flat = []
    for w, b in zip(wc, bc):
        in_specs += [full(w), full(b)]
        flat += [w, b]

    flops = 2 * Bp * sum(w.shape[0] * w.shape[1] for w in wc)
    bytes_accessed = (xc.size * xc.dtype.itemsize
                      + Bp * action_dim * 4
                      + sum(a.size * a.dtype.itemsize for a in flat))

    out = pl.pallas_call(
        dqn_kernel,
        out_shape=jax.ShapeDtypeStruct((Bp, action_dim), jnp.float32),
        grid=(grid,),
        in_specs=in_specs,
        out_specs=pl.BlockSpec((bm, action_dim), lambda i: (i, 0)),
        compiler_params=pltpu.CompilerParams(
            dimension_semantics=("parallel",)),
        cost_estimate=pl.CostEstimate(
            flops=int(flops), transcendentals=0,
            bytes_accessed=int(bytes_accessed)),
    )(xc, *flat)
    return out[:B]


def init_dqn_params(key, observation_dim, action_dim, num_layers=3, hidden_dim=128):
    """Deterministic synthetic init matching nn.Linear shapes.

    Returns list of (W, b) with W (in, out) = torch weight (out, in) transposed.
    """
    dims = [observation_dim] + [hidden_dim] * num_layers + [action_dim]
    params = []
    for in_d, out_d in zip(dims[:-1], dims[1:]):
        key, kw, kb = jax.random.split(key, 3)
        bound = 1.0 / jnp.sqrt(in_d)  # same fan-in scaling as torch default
        w = jax.random.uniform(kw, (in_d, out_d), jnp.float32, -bound, bound)
        b = jax.random.uniform(kb, (1, out_d), jnp.float32, -bound, bound)
        params.append((w, b))
    return params


def dqn_reference(x, params, compute_dtype=jnp.float32):
    """Pure-JAX reference mirroring the kernel's casting scheme."""
    h = x.astype(compute_dtype)
    for i, (w, b) in enumerate(params):
        h = jnp.dot(h, w.astype(compute_dtype),
                    preferred_element_type=jnp.float32)
        h = h + b.astype(jnp.float32)
        if i < len(params) - 1:
            h = jnp.maximum(h, 0.0).astype(compute_dtype)
    return h


if __name__ == "__main__":
    # Small shapes consistent with the module's forward.
    batch = 8
    observation_dim = 16
    action_dim = 4
    hidden_dim = 32
    num_layers = 3

    key = jax.random.PRNGKey(0)
    key, kx = jax.random.split(key)
    x = jax.random.normal(kx, (batch, observation_dim), jnp.float32)

    params = init_dqn_params(key, observation_dim, action_dim,
                             num_layers=num_layers, hidden_dim=hidden_dim)

    # Default bf16-operand path (halves HBM traffic; f32 accumulation).
    out_bf16 = jax.block_until_ready(dqn_forward(x, params))
    ref_bf16 = dqn_reference(x, params, compute_dtype=jnp.bfloat16)
    ref_f32 = dqn_reference(x, params, compute_dtype=jnp.float32)
    assert out_bf16.shape == (batch, action_dim)
    assert out_bf16.dtype == jnp.float32
    assert jnp.allclose(out_bf16, ref_bf16, atol=2e-3, rtol=2e-3)
    assert jnp.allclose(out_bf16, ref_f32, atol=5e-2, rtol=5e-2)

    # Full-f32 path matches the PyTorch module semantics tightly.
    out_f32 = jax.block_until_ready(
        dqn_forward(x, params, compute_dtype=jnp.float32))
    assert jnp.allclose(out_f32, ref_f32, atol=1e-4, rtol=1e-4)

    print("KERNEL_OK")
</pallas_src>

<mosaic_0001>
module attributes {stable_mosaic.version = 11 : i64} {
  func.func @dqn_kernel(%arg0: i32, %arg1: memref<16x16xbf16, #tpu.memory_space<vmem>>, %arg2: memref<16x32xbf16, #tpu.memory_space<vmem>>, %arg3: memref<1x32xf32, #tpu.memory_space<vmem>>, %arg4: memref<32x32xbf16, #tpu.memory_space<vmem>>, %arg5: memref<1x32xf32, #tpu.memory_space<vmem>>, %arg6: memref<32x32xbf16, #tpu.memory_space<vmem>>, %arg7: memref<1x32xf32, #tpu.memory_space<vmem>>, %arg8: memref<32x4xbf16, #tpu.memory_space<vmem>>, %arg9: memref<1x4xf32, #tpu.memory_space<vmem>>, %arg10: memref<16x4xf32, #tpu.memory_space<vmem>>) attributes {dimension_semantics = [#tpu.dimension_semantics<parallel>], iteration_bounds = array<i64: 1>, scalar_prefetch = 0 : i64, scratch_operands = 0 : i64, tpu.core_type = #tpu.core_type<tc>, window_params = [{transform_indices = @transform_0, window_bounds = array<i64: 16, 16>}, {pipeline_mode = #tpu.pipeline_mode<synchronous>, transform_indices = @transform_1, window_bounds = array<i64: 16, 32>}, {pipeline_mode = #tpu.pipeline_mode<synchronous>, transform_indices = @transform_2, window_bounds = array<i64: 1, 32>}, {pipeline_mode = #tpu.pipeline_mode<synchronous>, transform_indices = @transform_3, window_bounds = array<i64: 32, 32>}, {pipeline_mode = #tpu.pipeline_mode<synchronous>, transform_indices = @transform_4, window_bounds = array<i64: 1, 32>}, {pipeline_mode = #tpu.pipeline_mode<synchronous>, transform_indices = @transform_5, window_bounds = array<i64: 32, 32>}, {pipeline_mode = #tpu.pipeline_mode<synchronous>, transform_indices = @transform_6, window_bounds = array<i64: 1, 32>}, {pipeline_mode = #tpu.pipeline_mode<synchronous>, transform_indices = @transform_7, window_bounds = array<i64: 32, 4>}, {pipeline_mode = #tpu.pipeline_mode<synchronous>, transform_indices = @transform_8, window_bounds = array<i64: 1, 4>}, {transform_indices = @transform_9, window_bounds = array<i64: 16, 4>}]} {
    %c0 = arith.constant 0 : index
    %c0_0 = arith.constant 0 : index
    %0 = vector.load %arg1[%c0, %c0_0] : memref<16x16xbf16, #tpu.memory_space<vmem>>, vector<16x16xbf16>
    %c0_1 = arith.constant 0 : index
    %c0_2 = arith.constant 0 : index
    %1 = vector.load %arg2[%c0_1, %c0_2] : memref<16x32xbf16, #tpu.memory_space<vmem>>, vector<16x32xbf16>
    %cst = arith.constant dense<0.000000e+00> : vector<16x32xf32>
    %2 = tpu.matmul %0, %1, %cst {dimension_numbers = #tpu.dot_dimension_numbers<[1], [0], [0], [1], [0, 0, 1, 1], [], []>} : vector<16x16xbf16>, vector<16x32xbf16>, vector<16x32xf32> -> vector<16x32xf32>
    %c0_3 = arith.constant 0 : index
    %c0_4 = arith.constant 0 : index
    %3 = vector.load %arg3[%c0_3, %c0_4] : memref<1x32xf32, #tpu.memory_space<vmem>>, vector<1x32xf32>
    %4 = vector.broadcast %3 : vector<1x32xf32> to vector<16x32xf32>
    %5 = arith.addf %2, %4 : vector<16x32xf32>
    %cst_5 = arith.constant 0.000000e+00 : f32
    %6 = vector.broadcast %cst_5 : f32 to vector<16x32xf32>
    %7 = arith.maximumf %5, %6 : vector<16x32xf32>
    %8 = arith.truncf %7 : vector<16x32xf32> to vector<16x32xbf16>
    %c0_6 = arith.constant 0 : index
    %c0_7 = arith.constant 0 : index
    %9 = vector.load %arg4[%c0_6, %c0_7] : memref<32x32xbf16, #tpu.memory_space<vmem>>, vector<32x32xbf16>
    %cst_8 = arith.constant dense<0.000000e+00> : vector<16x32xf32>
    %10 = tpu.matmul %8, %9, %cst_8 {dimension_numbers = #tpu.dot_dimension_numbers<[1], [0], [0], [1], [0, 0, 1, 1], [], []>} : vector<16x32xbf16>, vector<32x32xbf16>, vector<16x32xf32> -> vector<16x32xf32>
    %c0_9 = arith.constant 0 : index
    %c0_10 = arith.constant 0 : index
    %11 = vector.load %arg5[%c0_9, %c0_10] : memref<1x32xf32, #tpu.memory_space<vmem>>, vector<1x32xf32>
    %12 = vector.broadcast %11 : vector<1x32xf32> to vector<16x32xf32>
    %13 = arith.addf %10, %12 : vector<16x32xf32>
    %cst_11 = arith.constant 0.000000e+00 : f32
    %14 = vector.broadcast %cst_11 : f32 to vector<16x32xf32>
    %15 = arith.maximumf %13, %14 : vector<16x32xf32>
    %16 = arith.truncf %15 : vector<16x32xf32> to vector<16x32xbf16>
    %c0_12 = arith.constant 0 : index
    %c0_13 = arith.constant 0 : index
    %17 = vector.load %arg6[%c0_12, %c0_13] : memref<32x32xbf16, #tpu.memory_space<vmem>>, vector<32x32xbf16>
    %cst_14 = arith.constant dense<0.000000e+00> : vector<16x32xf32>
    %18 = tpu.matmul %16, %17, %cst_14 {dimension_numbers = #tpu.dot_dimension_numbers<[1], [0], [0], [1], [0, 0, 1, 1], [], []>} : vector<16x32xbf16>, vector<32x32xbf16>, vector<16x32xf32> -> vector<16x32xf32>
    %c0_15 = arith.constant 0 : index
    %c0_16 = arith.constant 0 : index
    %19 = vector.load %arg7[%c0_15, %c0_16] : memref<1x32xf32, #tpu.memory_space<vmem>>, vector<1x32xf32>
    %20 = vector.broadcast %19 : vector<1x32xf32> to vector<16x32xf32>
    %21 = arith.addf %18, %20 : vector<16x32xf32>
    %cst_17 = arith.constant 0.000000e+00 : f32
    %22 = vector.broadcast %cst_17 : f32 to vector<16x32xf32>
    %23 = arith.maximumf %21, %22 : vector<16x32xf32>
    %24 = arith.truncf %23 : vector<16x32xf32> to vector<16x32xbf16>
    %c0_18 = arith.constant 0 : index
    %c0_19 = arith.constant 0 : index
    %25 = vector.load %arg8[%c0_18, %c0_19] : memref<32x4xbf16, #tpu.memory_space<vmem>>, vector<32x4xbf16>
    %cst_20 = arith.constant dense<0.000000e+00> : vector<16x4xf32>
    %26 = tpu.matmul %24, %25, %cst_20 {dimension_numbers = #tpu.dot_dimension_numbers<[1], [0], [0], [1], [0, 0, 1, 1], [], []>} : vector<16x32xbf16>, vector<32x4xbf16>, vector<16x4xf32> -> vector<16x4xf32>
    %c0_21 = arith.constant 0 : index
    %c0_22 = arith.constant 0 : index
    %27 = vector.load %arg9[%c0_21, %c0_22] : memref<1x4xf32, #tpu.memory_space<vmem>>, vector<1x4xf32>
    %28 = vector.broadcast %27 : vector<1x4xf32> to vector<16x4xf32>
    %29 = arith.addf %26, %28 : vector<16x4xf32>
    %c0_23 = arith.constant 0 : index
    %c0_24 = arith.constant 0 : index
    %30 = vector.load %arg10[%c0_23, %c0_24] : memref<16x4xf32, #tpu.memory_space<vmem>>, vector<16x4xf32>
    tpu.vector_store %arg10[%c0_23, %c0_24], %29 {strides = array<i32>} : memref<16x4xf32, #tpu.memory_space<vmem>>, vector<16x4xf32>,
    return
  }
  func.func @transform_0(%arg0: i32) -> (i32, i32) {
    %c0_i32 = arith.constant 0 : i32
    %c0_i32_0 = arith.constant 0 : i32
    return %arg0, %c0_i32 : i32, i32
  }
  func.func @transform_1(%arg0: i32) -> (i32, i32) {
    %c0_i32 = arith.constant 0 : i32
    %c0_i32_0 = arith.constant 0 : i32
    %c0_i32_1 = arith.constant 0 : i32
    return %c0_i32, %c0_i32_0 : i32, i32
  }
  func.func @transform_2(%arg0: i32) -> (i32, i32) {
    %c0_i32 = arith.constant 0 : i32
    %c0_i32_0 = arith.constant 0 : i32
    %c0_i32_1 = arith.constant 0 : i32
    return %c0_i32, %c0_i32_0 : i32, i32
  }
  func.func @transform_3(%arg0: i32) -> (i32, i32) {
    %c0_i32 = arith.constant 0 : i32
    %c0_i32_0 = arith.constant 0 : i32
    %c0_i32_1 = arith.constant 0 : i32
    return %c0_i32, %c0_i32_0 : i32, i32
  }
  func.func @transform_4(%arg0: i32) -> (i32, i32) {
    %c0_i32 = arith.constant 0 : i32
    %c0_i32_0 = arith.constant 0 : i32
    %c0_i32_1 = arith.constant 0 : i32
    return %c0_i32, %c0_i32_0 : i32, i32
  }
  func.func @transform_5(%arg0: i32) -> (i32, i32) {
    %c0_i32 = arith.constant 0 : i32
    %c0_i32_0 = arith.constant 0 : i32
    %c0_i32_1 = arith.constant 0 : i32
    return %c0_i32, %c0_i32_0 : i32, i32
  }
  func.func @transform_6(%arg0: i32) -> (i32, i32) {
    %c0_i32 = arith.constant 0 : i32
    %c0_i32_0 = arith.constant 0 : i32
    %c0_i32_1 = arith.constant 0 : i32
    return %c0_i32, %c0_i32_0 : i32, i32
  }
  func.func @transform_7(%arg0: i32) -> (i32, i32) {
    %c0_i32 = arith.constant 0 : i32
    %c0_i32_0 = arith.constant 0 : i32
    %c0_i32_1 = arith.constant 0 : i32
    return %c0_i32, %c0_i32_0 : i32, i32
  }
  func.func @transform_8(%arg0: i32) -> (i32, i32) {
    %c0_i32 = arith.constant 0 : i32
    %c0_i32_0 = arith.constant 0 : i32
    %c0_i32_1 = arith.constant 0 : i32
    return %c0_i32, %c0_i32_0 : i32, i32
  }
  func.func @transform_9(%arg0: i32) -> (i32, i32) {
    %c0_i32 = arith.constant 0 : i32
    %c0_i32_0 = arith.constant 0 : i32
    return %arg0, %c0_i32 : i32, i32
  }
}

</mosaic_0001>

<bundles_post_ra>
// kernel: tpu_custom_call.1
= control target key start
LH: loop header
LB: loop body
LE: loop exit
PB: predicated region body
PF: predicated region fallthrough
CT: control target
= control target key end

     0   :  { %14 = vsyncpa [#allocation3], 0  ;;  %s473_s0 = inlined_call_operand.hbm [shape: bf16[16,16], index: 0, kind: input, shape index: {}]   ;;  %s474_s1 = inlined_call_operand.hbm [shape: bf16[16,32], index: 1, kind: input, shape index: {}]   ;;  %s475_s2 = inlined_call_operand.vmem [shape: f32[1,32], index: 2, kind: input, shape index: {}]   ;;  %s476_s3 = inlined_call_operand.vmem [shape: bf16[32,32], index: 3, kind: input, shape index: {}]   ;;  %s477_s4 = inlined_call_operand.vmem [shape: f32[1,32], index: 4, kind: input, shape index: {}]   ;;  %s478_s5 = inlined_call_operand.hbm [shape: bf16[32,32], index: 5, kind: input, shape index: {}]   ;;  %s479_s6 = inlined_call_operand.vmem [shape: f32[1,32], index: 6, kind: input, shape index: {}]   ;;  %s480_s7 = inlined_call_operand.vmem [shape: bf16[32,4], index: 7, kind: input, shape index: {}]   ;;  %s481_s8 = inlined_call_operand.vmem [shape: f32[1,4], index: 8, kind: input, shape index: {}]   ;;  %s482_s9 = inlined_call_operand.vmem [shape: f32[16,4], index: 9, kind: output, shape index: {}]  }
   0x1   :  { %15 = vsyncpa [#allocation5], 0  ;;  %s33_s11 = sshll.u32 %s474_s1, 4  ;;  %s376_s12 = smov [#allocation4]   ;;  %s34_s11 = int_to_ptr.hbm [resolvable:$true] %s33_s11 }
   0x2   :  { %s35_s13 = sshll.u32 %s376_s12, 4  ;;  %s20_s16 = sshll.u32 %s473_s0, 4  ;;  %s36_s13 = int_to_ptr.vmem [resolvable:$true] %s35_s13  ;;  %s21_s16 = int_to_ptr.hbm [resolvable:$true] %s20_s16 }
   0x3   :  { %s377_s17 = smov 64   ;;  %s378_s18 = smov 4  }
   0x4   :  { %41 = dma.hbm_to_vmem [thread:$0]  %s34_s11, 128, %s36_s13, [#allocation5], %s377_s17, %s377_s17, %s378_s18  }
   0x5   :  { %s379_s19 = smov [#allocation2]   ;;  %s52_s23 = sshll.u32 %s478_s5, 4  ;;  %s53_s23 = int_to_ptr.hbm [resolvable:$true] %s52_s23 }
   0x6   :  { %s22_s20 = sshll.u32 %s379_s19, 4  ;;  %s380_s1 = smov [#allocation6]   ;;  %s23_s20 = int_to_ptr.vmem [resolvable:$true] %s22_s20 }
   0x7   :  { %28 = dma.hbm_to_vmem [thread:$0]  %s21_s16, 128, %s23_s20, [#allocation3], %s377_s17, %s377_s17, %s378_s18  }
   0x8   :  { %s54_s24 = sshll.u32 %s380_s1, 4  ;;  %s55_s24 = int_to_ptr.vmem [resolvable:$true] %s54_s24 }
   0x9   :  { %60 = dma.hbm_to_vmem [thread:$0]  %s53_s23, 256, %s55_s24, [#allocation5], %s377_s17, %s377_s17, %s378_s18  }
   0xa   :  { %372 = dma.done.wait [#allocation3], 128  }
   0xb   :  { %373 = vsyncadd [#allocation3], 4294967168 }
   0xc   :  { %374 = dma.done.wait [#allocation5], 384  }
   0xd   :  { %375 = vsyncadd [#allocation5], 4294966912  ;;  %v284_v0 = vld [vmem:[#allocation4] sm:$0xff]  ;;  %v283_v1 = vld [vmem:[#allocation2] sm:$0xff]  ;;  %vm99_vm0 = vcmask 130048   ;;  %vm140_vm1 = vcmask 261120  }
   0xe   :  { %110 = vmatpush.bf16.msra.mxu0 %v284_v0  ;;  %v286_v2 = vld [vmem:[%s476_s3 + $0x8] sm:$0xff]  ;;  %v285_v3 = vld [vmem:[%s476_s3] sm:$0xff]  ;;  %v288_v12 = vld [vmem:[#allocation6 + $0x8] sm:$0xff]  ;;  %vm238_vm2 = vcmask 31744  }
   0xf   :  { %150 = vmatpush.bf16.msra.mxu1 %v286_v2  ;;  %v296_v5 = vld [vmem:[%s475_s2] ss:$0 sm:$0xff]  ;;  %190 = vmatpush.bf16.msra.mxu2 %v288_v12  ;;  %v287_v13 = vld [vmem:[#allocation6] sm:$0xff]  ;;  %v290_v22 = vld [vmem:[%s480_s7 + $0x8] sm:$0xff] }
  0x10   :  { %v297_v15 = vld [vmem:[%s477_s4] ss:$0 sm:$0xff]  ;;  %230 = vmatpush.bf16.msra.mxu3 %v290_v22 }
  0x11   :  { %255 = vmatmul.msk.bf16.vlgmr.msra.gmra.mxu0 %vm99_vm0, %v283_v1  ;;  %v289_v23 = vld [vmem:[%s480_s7] sm:$0xff] }
  0x12   :  { %v298_v25 = vld [vmem:[%s479_s6] ss:$0 sm:$0xff] }
  0x13   :  { %151 = vmatpush.bf16.msra.mxu1 %v285_v3  ;;  %191 = vmatpush.bf16.msra.mxu2 %v287_v13  ;;  %v299_v32 = vld [vmem:[%s481_s8] ss:$0 sm:$0xff] }
  0x14   :  { %231 = vmatpush.bf16.msra.mxu3 %v289_v23 }
  0x8e   :  { %v112_v4 = vpop.f32.mrf.mxu0 }
  0x8f   :  { %v113_v6 = vadd.f32 %v296_v5, %v112_v4 }
  0x91   :  { %v117_v9 = vmax.f32 %v113_v6, 0.0 }
  0x96   :  { %v114_v7 = vpop.f32.mrf.mxu0 }
  0x97   :  { %v115_v8 = vadd.f32 %v296_v5, %v114_v7 }
  0x99   :  { %v118_v10 = vmax.f32 %v115_v8, 0.0 }
  0x9b   :  { %v119_v11 = vpack.c.bf16 %v118_v10, %v117_v9 }
  0x9d   :  { %264 = vmatmul.msk.bf16.vlgmr.msra.gmra.mxu1 %vm140_vm1, %v119_v11 }
 0x11a   :  { %v153_v14 = vpop.f32.mrf.mxu1 }
 0x11b   :  { %v154_v16 = vadd.f32 %v297_v15, %v153_v14 }
 0x11d   :  { %v158_v19 = vmax.f32 %v154_v16, 0.0 }
 0x122   :  { %v155_v17 = vpop.f32.mrf.mxu1 }
 0x123   :  { %v156_v18 = vadd.f32 %v297_v15, %v155_v17 }
 0x125   :  { %v159_v20 = vmax.f32 %v156_v18, 0.0 }
 0x127   :  { %v160_v21 = vpack.c.bf16 %v159_v20, %v158_v19 }
 0x129   :  { %273 = vmatmul.msk.bf16.vlgmr.msra.gmra.mxu2 %vm140_vm1, %v160_v21 }
 0x1ac   :  { %v193_v24 = vpop.f32.mrf.mxu2 }
 0x1ad   :  { %v194_v26 = vadd.f32 %v298_v25, %v193_v24 }
 0x1af   :  { %v198_v29 = vmax.f32 %v194_v26, 0.0 }
 0x1b4   :  { %v195_v27 = vpop.f32.mrf.mxu2 }
 0x1b5   :  { %v196_v28 = vadd.f32 %v298_v25, %v195_v27 }
 0x1b7   :  { %v199_v30 = vmax.f32 %v196_v28, 0.0 }
 0x1b9   :  { %v200_v31 = vpack.c.bf16 %v199_v30, %v198_v29 }
 0x1bb   :  { %282 = vmatmul.msk.bf16.vlgmr.msra.gmra.mxu3 %vm140_vm1, %v200_v31 }
 0x23e   :  { %v233_v33 = vpop.f32.mrf.mxu3 }
 0x23f   :  { %v234_v34 = vadd.f32 %v299_v32, %v233_v33 }
 0x241   :  { %239 = vst.msk [vmem:[%s482_s9] sm:$0xff] %vm238_vm2, %v234_v34 }
 0x246   :  { %v235_v35 = vpop.f32.mrf.mxu3 }
 0x247   :  { %v236_v36 = vadd.f32 %v299_v32, %v235_v35 }
 0x249   :  { %240 = vst.msk [vmem:[%s482_s9 + $0x8] sm:$0xff] %vm238_vm2, %v236_v36 }
 0x24a   :  { %245 = vsyncpa [#allocation3], 1 }
 0x24b   :  { %246 = vsyncpa [#allocation5], 1 }

</bundles_post_ra>
